<compile_context>
chip_gen: v7x
topology: tpu7x:2x2x1
jax: 0.10.0
libtpu: 0.0.40
codegen_flags: <defaults>
</compile_context>

<pallas_src>
import functools

import jax
import jax.numpy as jnp
from jax import lax
from jax.experimental import pallas as pl
from jax.experimental.pallas import tpu as pltpu


# ----------------------------------------------------------------------------
# Kernels
# ----------------------------------------------------------------------------
def _cross_packed_mxu_kernel(x_ref, m_ref, b_ref, o_ref, *, num_layers):
    # x_ref: (tb, Dk)  m_ref: (L, Dk, Dk)  b_ref: (L, Dk)  o_ref: (tb, Dk)
    x0 = x_ref[...].astype(jnp.float32)
    x = x0
    for l in range(num_layers):
        # Block-diagonal matmul = segmented <x_row, w_l> reduction AND the
        # broadcast back across the D lanes of each segment, in one MXU op.
        xw = jnp.dot(
            x,
            m_ref[l],
            preferred_element_type=jnp.float32,
            precision=lax.Precision.HIGHEST,
        )
        x = x0 * xw + b_ref[l : l + 1, :].astype(jnp.float32) + x
    o_ref[...] = x.astype(o_ref.dtype)


def _cross_lane_kernel(x_ref, w_ref, b_ref, o_ref, *, num_layers):
    # Unpacked layout (k == 1).  x_ref: (tb, Dk)  w_ref/b_ref: (L, Dk)
    x0 = x_ref[...].astype(jnp.float32)
    x = x0
    for l in range(num_layers):
        w_row = w_ref[l : l + 1, :].astype(jnp.float32)   # (1, Dk), stays 2-D
        b_row = b_ref[l : l + 1, :].astype(jnp.float32)   # (1, Dk)
        xw = jnp.sum(x * w_row, axis=-1, keepdims=True)   # XLU lane reduce
        x = x0 * xw + b_row + x
    o_ref[...] = x.astype(o_ref.dtype)


# ----------------------------------------------------------------------------
# Wrapper
# ----------------------------------------------------------------------------
_VMEM_TILE_BUDGET = 24 * 1024 * 1024   # bytes used for tile sizing (safe on v7x)
_VMEM_LIMIT_BYTES = 48 * 1024 * 1024   # above scoped default, below v7x physical


def cross_network(x, w, b, *, tile_batch=1024):
    """DCN cross network.  x: [B, D], w: [L, D], b: [L, D] -> [B, D]."""
    B, D = x.shape
    L = w.shape[0]
    orig_dtype = x.dtype

    # ---- choose a lane-dense layout -----------------------------------------
    if D % 128 == 0:
        k, Dp = 1, D                               # already lane dense
    elif D < 128 and 128 % D == 0:
        k, Dp = 128 // D, D                        # fold k rows per packed row
    else:
        k, Dp = 1, pl.cdiv(D, 128) * 128           # zero-pad features

    if Dp != D:
        x = jnp.pad(x, ((0, 0), (0, Dp - D)))
        w = jnp.pad(w, ((0, 0), (0, Dp - D)))
        b = jnp.pad(b, ((0, 0), (0, Dp - D)))

    Bpad = pl.cdiv(B, k) * k
    if Bpad != B:
        x = jnp.pad(x, ((0, Bpad - B), (0, 0)))
    Bp = Bpad // k                                 # packed batch
    Dk = k * Dp                                    # packed lane width (mult of 128)
    xp = x.reshape(Bp, Dk)                         # free: contiguous reshape

    use_mxu = k > 1                                # only pack-path needs the MXU trick

    # ---- tile the packed batch: biggest tile within the VMEM budget --------
    if use_mxu:
        param_bytes = 2 * L * Dk * Dk * 4 + 2 * L * Dk * 4   # M + bias, dbl-buffered
    else:
        param_bytes = 2 * 2 * L * Dk * 4                     # w + bias, dbl-buffered
    tb = min(tile_batch, Bp)
    while tb > 8 and param_bytes + 4 * tb * Dk * 4 > _VMEM_TILE_BUDGET:
        tb //= 2
    if tb < Bp:
        tb = max(8, (tb // 8) * 8)                 # (8, 128) tiling constraint
    else:
        tb = Bp                                    # full-extent block is always legal
    grid = (pl.cdiv(Bp, tb),)

    compiler_params = pltpu.CompilerParams(
        dimension_semantics=("parallel",),
        vmem_limit_bytes=_VMEM_LIMIT_BYTES,
    )

    if use_mxu:
        # M[l] = kron(I_k, outer(w_l, ones(D)))  -> (Dk, Dk) block diagonal.
        eye_k = jnp.eye(k, dtype=jnp.float32)
        ones_d = jnp.ones((Dp,), dtype=jnp.float32)
        M = jax.vmap(
            lambda wl: jnp.kron(eye_k, jnp.outer(wl.astype(jnp.float32), ones_d))
        )(w)                                                   # (L, Dk, Dk) f32
        b_packed = jnp.tile(b.astype(jnp.float32), (1, k))     # (L, Dk) f32

        kernel = functools.partial(_cross_packed_mxu_kernel, num_layers=L)
        out = pl.pallas_call(
            kernel,
            out_shape=jax.ShapeDtypeStruct((Bp, Dk), orig_dtype),
            grid_spec=pltpu.PrefetchScalarGridSpec(
                num_scalar_prefetch=0,
                grid=grid,
                in_specs=[
                    pl.BlockSpec((tb, Dk), lambda i: (i, 0)),        # x tile
                    pl.BlockSpec((L, Dk, Dk), lambda i: (0, 0, 0)),  # all layer M's
                    pl.BlockSpec((L, Dk), lambda i: (0, 0)),         # all layer biases
                ],
                out_specs=pl.BlockSpec((tb, Dk), lambda i: (i, 0)),
            ),
            compiler_params=compiler_params,
        )(xp, M, b_packed)
    else:
        kernel = functools.partial(_cross_lane_kernel, num_layers=L)
        out = pl.pallas_call(
            kernel,
            out_shape=jax.ShapeDtypeStruct((Bp, Dk), orig_dtype),
            grid_spec=pltpu.PrefetchScalarGridSpec(
                num_scalar_prefetch=0,
                grid=grid,
                in_specs=[
                    pl.BlockSpec((tb, Dk), lambda i: (i, 0)),  # x tile
                    pl.BlockSpec((L, Dk), lambda i: (0, 0)),   # all layer weights
                    pl.BlockSpec((L, Dk), lambda i: (0, 0)),   # all layer biases
                ],
                out_specs=pl.BlockSpec((tb, Dk), lambda i: (i, 0)),
            ),
            compiler_params=compiler_params,
        )(xp, w, b)

    return out.reshape(Bpad, Dp)[:B, :D]


# ----------------------------------------------------------------------------
# Pure-JAX reference (mirrors the PyTorch module)
# ----------------------------------------------------------------------------
def cross_network_ref(x, w, b):
    x0 = x
    out = x
    for i in range(w.shape[0]):
        xw = out @ w[i][:, None]            # (B, 1)
        out = x0 * xw + b[i][None, :] + out
    return out


if __name__ == "__main__":
    batch = 8
    input_dim = 32
    num_layers = 3

    key = jax.random.PRNGKey(0)
    kx, kw = jax.random.split(key)

    x = jax.random.normal(kx, (batch, input_dim), dtype=jnp.float32)

    # nn.Linear(input_dim, 1, bias=False) default init: U(-1/sqrt(fan_in), 1/sqrt(fan_in))
    bound = 1.0 / jnp.sqrt(jnp.float32(input_dim))
    w = jax.random.uniform(kw, (num_layers, input_dim), dtype=jnp.float32,
                           minval=-bound, maxval=bound)
    # nn.Parameter(torch.zeros((input_dim,))) per layer
    b = jnp.zeros((num_layers, input_dim), dtype=jnp.float32)

    out = jax.block_until_ready(cross_network(x, w, b))
    ref = cross_network_ref(x, w, b)

    assert out.shape == (batch, input_dim)
    assert jnp.allclose(out, ref, atol=1e-4, rtol=1e-4), "mismatch vs reference"

    print("KERNEL_OK")
</pallas_src>

<mosaic_0001>
module attributes {stable_mosaic.version = 11 : i64} {
  func.func @_cross_packed_mxu_kernel(%arg0: i32, %arg1: memref<2x128xf32, #tpu.memory_space<vmem>>, %arg2: memref<3x128x128xf32, #tpu.memory_space<vmem>>, %arg3: memref<3x128xf32, #tpu.memory_space<vmem>>, %arg4: memref<2x128xf32, #tpu.memory_space<vmem>>) attributes {dimension_semantics = [#tpu.dimension_semantics<parallel>], iteration_bounds = array<i64: 1>, scalar_prefetch = 0 : i64, scratch_operands = 0 : i64, tpu.core_type = #tpu.core_type<tc>, window_params = [{transform_indices = @transform_0, window_bounds = array<i64: 2, 128>}, {pipeline_mode = #tpu.pipeline_mode<synchronous>, transform_indices = @transform_1, window_bounds = array<i64: 3, 128, 128>}, {pipeline_mode = #tpu.pipeline_mode<synchronous>, transform_indices = @transform_2, window_bounds = array<i64: 3, 128>}, {transform_indices = @transform_3, window_bounds = array<i64: 2, 128>}]} {
    %c0 = arith.constant 0 : index
    %c0_0 = arith.constant 0 : index
    %0 = vector.load %arg1[%c0, %c0_0] : memref<2x128xf32, #tpu.memory_space<vmem>>, vector<2x128xf32>
    %c0_1 = arith.constant 0 : index
    %c0_2 = arith.constant 0 : index
    %c0_3 = arith.constant 0 : index
    %1 = vector.load %arg2[%c0_1, %c0_2, %c0_3] : memref<3x128x128xf32, #tpu.memory_space<vmem>>, vector<1x128x128xf32>
    %2 = vector.shape_cast %1 : vector<1x128x128xf32> to vector<128x128xf32>
    %cst = arith.constant dense<0.000000e+00> : vector<2x128xf32>
    %3 = tpu.matmul %0, %2, %cst {dimension_numbers = #tpu.dot_dimension_numbers<[1], [0], [0], [1], [0, 0, 1, 1], [], []>, precision = #tpu.contract_precision<fp32>} : vector<2x128xf32>, vector<128x128xf32>, vector<2x128xf32> -> vector<2x128xf32>
    %4 = arith.mulf %0, %3 : vector<2x128xf32>
    %c0_4 = arith.constant 0 : index
    %c0_5 = arith.constant 0 : index
    %5 = vector.load %arg3[%c0_4, %c0_5] : memref<3x128xf32, #tpu.memory_space<vmem>>, vector<1x128xf32>
    %6 = vector.broadcast %5 : vector<1x128xf32> to vector<2x128xf32>
    %7 = arith.addf %4, %6 : vector<2x128xf32>
    %8 = arith.addf %7, %0 : vector<2x128xf32>
    %c1 = arith.constant 1 : index
    %c0_6 = arith.constant 0 : index
    %c0_7 = arith.constant 0 : index
    %9 = vector.load %arg2[%c1, %c0_6, %c0_7] : memref<3x128x128xf32, #tpu.memory_space<vmem>>, vector<1x128x128xf32>
    %10 = vector.shape_cast %9 : vector<1x128x128xf32> to vector<128x128xf32>
    %cst_8 = arith.constant dense<0.000000e+00> : vector<2x128xf32>
    %11 = tpu.matmul %8, %10, %cst_8 {dimension_numbers = #tpu.dot_dimension_numbers<[1], [0], [0], [1], [0, 0, 1, 1], [], []>, precision = #tpu.contract_precision<fp32>} : vector<2x128xf32>, vector<128x128xf32>, vector<2x128xf32> -> vector<2x128xf32>
    %12 = arith.mulf %0, %11 : vector<2x128xf32>
    %c1_9 = arith.constant 1 : index
    %c0_10 = arith.constant 0 : index
    %13 = vector.load %arg3[%c1_9, %c0_10] : memref<3x128xf32, #tpu.memory_space<vmem>>, vector<1x128xf32>
    %14 = vector.broadcast %13 : vector<1x128xf32> to vector<2x128xf32>
    %15 = arith.addf %12, %14 : vector<2x128xf32>
    %16 = arith.addf %15, %8 : vector<2x128xf32>
    %c2 = arith.constant 2 : index
    %c0_11 = arith.constant 0 : index
    %c0_12 = arith.constant 0 : index
    %17 = vector.load %arg2[%c2, %c0_11, %c0_12] : memref<3x128x128xf32, #tpu.memory_space<vmem>>, vector<1x128x128xf32>
    %18 = vector.shape_cast %17 : vector<1x128x128xf32> to vector<128x128xf32>
    %cst_13 = arith.constant dense<0.000000e+00> : vector<2x128xf32>
    %19 = tpu.matmul %16, %18, %cst_13 {dimension_numbers = #tpu.dot_dimension_numbers<[1], [0], [0], [1], [0, 0, 1, 1], [], []>, precision = #tpu.contract_precision<fp32>} : vector<2x128xf32>, vector<128x128xf32>, vector<2x128xf32> -> vector<2x128xf32>
    %20 = arith.mulf %0, %19 : vector<2x128xf32>
    %c2_14 = arith.constant 2 : index
    %c0_15 = arith.constant 0 : index
    %21 = vector.load %arg3[%c2_14, %c0_15] : memref<3x128xf32, #tpu.memory_space<vmem>>, vector<1x128xf32>
    %22 = vector.broadcast %21 : vector<1x128xf32> to vector<2x128xf32>
    %23 = arith.addf %20, %22 : vector<2x128xf32>
    %24 = arith.addf %23, %16 : vector<2x128xf32>
    %c0_16 = arith.constant 0 : index
    %c0_17 = arith.constant 0 : index
    %25 = vector.load %arg4[%c0_16, %c0_17] : memref<2x128xf32, #tpu.memory_space<vmem>>, vector<2x128xf32>
    tpu.vector_store %arg4[%c0_16, %c0_17], %24 {strides = array<i32>} : memref<2x128xf32, #tpu.memory_space<vmem>>, vector<2x128xf32>,
    return
  }
  func.func @transform_0(%arg0: i32) -> (i32, i32) {
    %c0_i32 = arith.constant 0 : i32
    %c0_i32_0 = arith.constant 0 : i32
    return %arg0, %c0_i32 : i32, i32
  }
  func.func @transform_1(%arg0: i32) -> (i32, i32, i32) {
    %c0_i32 = arith.constant 0 : i32
    %c0_i32_0 = arith.constant 0 : i32
    %c0_i32_1 = arith.constant 0 : i32
    %c0_i32_2 = arith.constant 0 : i32
    return %c0_i32, %c0_i32_0, %c0_i32_1 : i32, i32, i32
  }
  func.func @transform_2(%arg0: i32) -> (i32, i32) {
    %c0_i32 = arith.constant 0 : i32
    %c0_i32_0 = arith.constant 0 : i32
    %c0_i32_1 = arith.constant 0 : i32
    return %c0_i32, %c0_i32_0 : i32, i32
  }
  func.func @transform_3(%arg0: i32) -> (i32, i32) {
    %c0_i32 = arith.constant 0 : i32
    %c0_i32_0 = arith.constant 0 : i32
    return %arg0, %c0_i32 : i32, i32
  }
}

</mosaic_0001>

<bundles_post_ra>
// kernel: tpu_custom_call.1
= control target key start
LH: loop header
LB: loop body
LE: loop exit
PB: predicated region body
PF: predicated region fallthrough
CT: control target
= control target key end

     0   :  { %8 = vsyncpa [#allocation3], 0  ;;  %s4513_s0 = inlined_call_operand.hbm [shape: f32[2,128], index: 0, kind: input, shape index: {}]   ;;  %s4514_s1 = inlined_call_operand.hbm [shape: f32[3,128,128], index: 1, kind: input, shape index: {}]   ;;  %s4515_s2 = inlined_call_operand.vmem [shape: f32[3,128], index: 2, kind: input, shape index: {}]   ;;  %s4516_s3 = inlined_call_operand.hbm [shape: f32[2,128], index: 3, kind: output, shape index: {}]  }
   0x1   :  { %9 = vsyncpa [#allocation6], 0 }
   0x2   :  { %10 = vsyncpa [#allocation4], 0  ;;  %s3537_s12 = smov [#allocation2]   ;;  %s3538_s14 = smov [#allocation5]  }
   0x3   :  { %s17_s13 = sshll.u32 %s3537_s12, 4  ;;  %s26_s15 = sshll.u32 %s3538_s14, 4  ;;  %s18_s13 = int_to_ptr.vmem [resolvable:$true] %s17_s13  ;;  %s3565_s15 = int_to_ptr.vmem [resolvable:$true] %s26_s15 }
   0x4   :  { %s3465_s18 = scalar_lea.hbm %s4513_s0, 32 }
   0x5   :  { %p3466_p0 = scmp.ne.s32.totalorder %s4513_s0, %s3465_s18  ;;  %p3469_p1 = scmp.lt.u32.totalorder %s3465_s18, %s4513_s0 }
   0x7   :  { %p3471_p2 = pnand %p3469_p1, %p3466_p0 }
   0x9   :  { %3474 = shalt.err (!%p3471_p2)
}
   0xa   :  { %s3475_s23 = scalar_lea.vmem %s18_s13, 32  ;;  %p3480_p4 = scmp.lt.s32.totalorder %s18_s13, %s18_s13 }
   0xb   :  { %p3476_p3 = scmp.ne.s32.totalorder %s18_s13, %s3475_s23  ;;  %p3481_p5 = scmp.lt.s32.totalorder %s3475_s23, %s3475_s23 }
   0xd   :  { %p3482_p6 = por %p3481_p5, %p3480_p4 }
   0xf   :  { %p3483_p7 = pnand %p3482_p6, %p3476_p3 }
  0x11   :  { %3486 = shalt.err (!%p3483_p7)
}
  0x12   :  { %20 = dma.hbm_to_vmem [thread:$0]  %s4513_s0, 32, %s18_s13, [#allocation3]  }
  0x13   :  { %s3487_s28 = scalar_lea.hbm %s4514_s1, 6144 }
  0x14   :  { %p3488_p8 = scmp.ne.s32.totalorder %s4514_s1, %s3487_s28  ;;  %p3491_p9 = scmp.lt.u32.totalorder %s3487_s28, %s4514_s1 }
  0x16   :  { %p3493_p10 = pnand %p3491_p9, %p3488_p8 }
  0x18   :  { %3496 = shalt.err (!%p3493_p10)
}
  0x19   :  { %s3497_s6 = scalar_lea.vmem %s3565_s15, 6144  ;;  %p3502_p12 = scmp.lt.s32.totalorder %s3565_s15, %s3565_s15 }
  0x1a   :  { %p3498_p11 = scmp.ne.s32.totalorder %s3565_s15, %s3497_s6  ;;  %p3503_p13 = scmp.lt.s32.totalorder %s3497_s6, %s3497_s6 }
  0x1c   :  { %p3504_p0 = por %p3503_p13, %p3502_p12 }
  0x1e   :  { %p3505_p1 = pnand %p3504_p0, %p3498_p11 }
  0x20   :  { %3508 = shalt.err (!%p3505_p1)
}
  0x21   :  { %s3539_s0 = smov 128   ;;  %s3540_s7 = smov 8  }
  0x22   :  { %32 = dma.hbm_to_vmem [thread:$0]  %s4514_s1, 6144, %s3565_s15, [#allocation6], %s3539_s0, %s3539_s0, %s3540_s7  }
  0x23   :  { %3531 = dma.done.wait [#allocation3], 32  }
  0x24   :  { %3532 = vsyncadd [#allocation3], 4294967264 }
  0x25   :  { %3533 = dma.done.wait [#allocation6], 6144  }
  0x26   :  { %3534 = vsyncadd [#allocation6], 4294961152  ;;  %v4533_v0 = vmov 0.0|0.0   ;;  %vm3542_vm0 = vmmov 0   ;;  %v4525_v1 = vmov 0.0   ;;  %v42_v2 = vld [vmem:[#allocation5] sm:$0xff] }
  0x27   :  { %2995 = vmatprep.subr.bf16.mxu1 %v4533_v0  ;;  %3067 = vmatprep.subr.bf16.mxu0 %v4533_v0  ;;  %v43_v3 = vld [vmem:[#allocation5 + $0x8] sm:$0xff]  ;;  %v44_v4 = vld [vmem:[#allocation5 + $0x10] sm:$0xff]  ;;  %v59_v5 = vand.u32 4294901760, %v42_v2  ;;  %v45_v7 = vld [vmem:[#allocation5 + $0x18] sm:$0xff]  ;;  %s3544_s15 = smov [#allocation7]  }
  0x28   :  { %2397 = vmatprep.mubr.msk.f32.mxu1 %vm3542_vm0, %v4525_v1  ;;  %2502 = vmatprep.mubr.msk.f32.mxu0 %vm3542_vm0, %v4525_v1  ;;  %v62_v6 = vand.u32 4294901760, %v43_v3  ;;  %v65_v8 = vand.u32 4294901760, %v44_v4  ;;  %v68_v9 = vand.u32 4294901760, %v45_v7  ;;  %v46_v10 = vld [vmem:[#allocation5 + $0x20] sm:$0xff]  ;;  %v47_v11 = vld [vmem:[#allocation5 + $0x28] sm:$0xff]  ;;  %v3610_v16 = vld [vmem:[#allocation5 + $0x30] sm:$0xff] }
  0x29   :  { %v71_v14 = vand.u32 4294901760, %v46_v10  ;;  %v74_v15 = vand.u32 4294901760, %v47_v11  ;;  %v3612_v17 = vld [vmem:[#allocation5 + $0x38] sm:$0xff]  ;;  %v77_v19 = vand.u32 4294901760, %v3610_v16  ;;  %v50_v21 = vld [vmem:[#allocation5 + $0x40] sm:$0xff]  ;;  %v51_v22 = vld [vmem:[#allocation5 + $0x48] sm:$0xff]  ;;  %v3632_v27 = vsub.f32 %v42_v2, %v59_v5 }
  0x2a   :  { %v3602_v12 = vpack.c.bf16 %v62_v6, %v59_v5  ;;  %v3606_v13 = vpack.c.bf16 %v68_v9, %v65_v8  ;;  %v80_v20 = vand.u32 4294901760, %v3612_v17  ;;  %v83_v24 = vand.u32 4294901760, %v50_v21  ;;  %v3630_v26 = vld [vmem:[#allocation2] sm:$0x3]  ;;  %v3638_v29 = vld [vmem:[#allocation5 + $0x50] sm:$0xff]  ;;  %v3657_v37 = vld [vmem:[#allocation5 + $0x60] sm:$0xff] }
  0x2b   :  { %v3616_v18 = vpack.c.bf16 %v74_v15, %v71_v14  ;;  %v86_v25 = vand.u32 4294901760, %v51_v22  ;;  %4558 = vst [vmem:[#allocation11_spill] sm:$0xff] %v3630_v26  ;;  %v3634_v28 = vsub.f32 %v43_v3, %v62_v6  ;;  %v3640_v30 = vld [vmem:[#allocation5 + $0x58] sm:$0xff]  ;;  %v3643_v31 = vand.u32 4294901760, %v3630_v26  ;;  %v3659_v38 = vld [vmem:[#allocation5 + $0x68] sm:$0xff]  ;;  %v3679_v46 = vld [vmem:[#allocation5 + $0x70] sm:$0xff] }
  0x2c   :  { %2997 = vmatpush3.bf16.msra.mxu1 %v3602_v12  ;;  %3069 = vmatpush3.bf16.msra.mxu0 %v3602_v12  ;;  %v3628_v23 = vpack.c.bf16 %v80_v20, %v77_v19  ;;  %v3645_v32 = vsub.f32 %v44_v4, %v65_v8  ;;  %v89_v34 = vand.u32 4294901760, %v3638_v29  ;;  %v92_v35 = vand.u32 4294901760, %v3640_v30  ;;  %v3681_v47 = vld [vmem:[#allocation5 + $0x78] sm:$0xff]  ;;  %v3712_v63 = vld [vmem:[#allocation5 + $0x80] sm:$0xff]  ;;  %v3724_v4 = vld [vmem:[#allocation5 + $0x88] sm:$0xff]  ;;  %s2046_s16 = sshll.u32 %s3544_s15, 4  ;;  %s2047_s16 = int_to_ptr.vmem [resolvable:$true] %s2046_s16 }
  0x2d   :  { %2998 = vmatprep.subr.bf16.mxu1 %v4533_v0  ;;  %3070 = vmatprep.subr.bf16.mxu0 %v4533_v0  ;;  %v3649_v33 = vpack.c.bf16 %v86_v25, %v83_v24  ;;  %v3653_v36 = vsub.f32 %v45_v7, %v68_v9  ;;  %v152_v39 = vand.u32 4294901760, %v3632_v27  ;;  %v159_v40 = vand.u32 4294901760, %v3634_v28  ;;  %v3737_v9 = vld [vmem:[#allocation5 + $0x90] sm:$0xff]  ;;  %s3509_s17 = scalar_lea.vmem %s2047_s16, 32  ;;  %p3514_p3 = scmp.lt.s32.totalorder %s2047_s16, %s2047_s16 }
  0x2e   :  { %v3663_v41 = vsub.f32 %v46_v10, %v71_v14  ;;  %v3667_v42 = vsub.f32 %v3630_v26, %v3643_v31  ;;  %v3675_v43 = vpack.c.bf16 %v92_v35, %v89_v34  ;;  %v4530_v44 = vand.u32 4294901760, %v3657_v37  ;;  %v3739_v10 = vld [vmem:[#allocation5 + $0x98] sm:$0xff]  ;;  %p3510_p2 = scmp.ne.s32.totalorder %s2047_s16, %s3509_s17  ;;  %p3515_p4 = scmp.lt.s32.totalorder %s3509_s17, %s3509_s17 }
  0x2f   :  { %v4529_v45 = vand.u32 4294901760, %v3659_v38  ;;  %v166_v48 = vand.u32 4294901760, %v3645_v32  ;;  %v3684_v49 = vsub.f32 %v47_v11, %v74_v15  ;;  %v153_v50 = vsub.f32 %v3632_v27, %v152_v39 }
  0x30   :  { %3000 = vmatpush3.bf16.msra.mxu1 %v3606_v13  ;;  %3072 = vmatpush3.bf16.msra.mxu0 %v3606_v13  ;;  %v160_v51 = vsub.f32 %v3634_v28, %v159_v40  ;;  %v173_v52 = vand.u32 4294901760, %v3653_v36  ;;  %v4519_v53 = vand.u32 4294901760, %v3679_v46  ;;  %v4517_v54 = vand.u32 4294901760, %v3681_v47  ;;  %p3516_p5 = por %p3515_p4, %p3514_p3 }
  0x31   :  { %3001 = vmatprep.subr.bf16.mxu1 %v4533_v0  ;;  %3073 = vmatprep.subr.bf16.mxu0 %v4533_v0  ;;  %v141_v55 = vand.u32 4294901760, %v3667_v42  ;;  %v3700_v56 = vpack.c.bf16 %v4529_v45, %v4530_v44  ;;  %v3705_v57 = vsub.f32 %v3645_v32, %v166_v48  ;;  %v4523_v58 = vand.u32 4294901760, %v3663_v41 }
  0x32   :  { %v154_v59 = vand.u32 4294901760, %v153_v50  ;;  %v161_v60 = vand.u32 4294901760, %v160_v51  ;;  %v174_v61 = vsub.f32 %v3653_v36, %v173_v52  ;;  %v4521_v62 = vand.u32 4294901760, %v3684_v49  ;;  %p3517_p6 = pnand %p3516_p5, %p3510_p2 }
  0x33   :  { %v3717_v2 = vsub.f32 %v3610_v16, %v77_v19  ;;  %v3722_v3 = vsub.f32 %v3612_v17, %v80_v20  ;;  %v3726_v5 = vsub.f32 %v50_v21, %v83_v24  ;;  %v3728_v6 = vsub.f32 %v51_v22, %v86_v25  ;;  %v3748_v17 = vld [vmem:[#allocation5 + $0xa0] sm:$0xff]  ;;  %v3750_v19 = vld [vmem:[#allocation5 + $0xa8] sm:$0xff]  ;;  %v3758_v25 = vld [vmem:[#allocation5 + $0xb0] sm:$0xff] }
  0x34   :  { %3003 = vmatpush3.bf16.msra.mxu1 %v3616_v18  ;;  %3075 = vmatpush3.bf16.msra.mxu0 %v3616_v18  ;;  %v3734_v7 = vpack.c.bf16 %v4517_v54, %v4519_v53  ;;  %v142_v8 = vsub.f32 %v3667_v42, %v141_v55  ;;  %v3092_v11 = vpack.c.bf16 %v159_v40, %v152_v39  ;;  %v168_v14 = vand.u32 4294901760, %v3705_v57  ;;  %v3768_v57 = vld [vmem:[#allocation5 + $0xb8] sm:$0xff] }
  0x35   :  { %3004 = vmatprep.subr.bf16.mxu1 %v4533_v0  ;;  %3076 = vmatprep.subr.bf16.mxu0 %v4533_v0  ;;  %v181_v15 = vsub.f32 %v3663_v41, %v4523_v58  ;;  %v4518_v16 = vand.u32 4294901760, %v3712_v63  ;;  %v3020_v20 = vpack.c.bf16 %v161_v60, %v154_v59  ;;  %v175_v21 = vand.u32 4294901760, %v174_v61 }
  0x36   :  { %v188_v22 = vsub.f32 %v3684_v49, %v4521_v62  ;;  %v4520_v24 = vand.u32 4294901760, %v3724_v4  ;;  %v194_v39 = vand.u32 4294901760, %v3717_v2  ;;  %v4522_v50 = vand.u32 4294901760, %v3737_v9 }
  0x37   :  { %v3764_v40 = vsub.f32 %v3712_v63, %v4518_v16  ;;  %v4524_v51 = vand.u32 4294901760, %v3739_v10  ;;  %v143_v59 = vand.u32 4294901760, %v142_v8  ;;  %v4527_v61 = vand.u32 4294901760, %v3748_v17 }
  0x38   :  { %3006 = vmatpush3.bf16.msra.mxu1 %v3628_v23  ;;  %3078 = vmatpush3.bf16.msra.mxu0 %v3628_v23  ;;  %v3773_v60 = vsub.f32 %v3724_v4, %v4520_v24  ;;  %v4528_v54 = vand.u32 4294901760, %v3750_v19  ;;  %v201_v16 = vand.u32 4294901760, %v3722_v3  ;;  %v3783_v53 = vsub.f32 %v3737_v9, %v4522_v50 }
  0x39   :  { %3007 = vmatprep.subr.bf16.mxu1 %v4533_v0  ;;  %3079 = vmatprep.subr.bf16.mxu0 %v4533_v0  ;;  %v3788_v8 = vsub.f32 %v3739_v10, %v4524_v51  ;;  %v4532_v24 = vand.u32 4294901760, %v3758_v25  ;;  %v3796_v62 = vsub.f32 %v3748_v17, %v4527_v61  ;;  %v4531_v58 = vand.u32 4294901760, %v3768_v57 }
  0x3a   :  { %v3801_v50 = vsub.f32 %v3750_v19, %v4528_v54  ;;  %v3807_v51 = vsub.f32 %v3638_v29, %v89_v34  ;;  %v3812_v1 = vsub.f32 %v3640_v30, %v92_v35  ;;  %v3095_v61 = vpack.c.bf16 %v173_v52, %v166_v48 }
  0x3b   :  { %v3819_v54 = vsub.f32 %v3758_v25, %v4532_v24  ;;  %v182_v45 = vand.u32 4294901760, %v181_v15  ;;  %v189_v44 = vand.u32 4294901760, %v188_v22  ;;  %v208_v29 = vand.u32 4294901760, %v3726_v5 }
  0x3c   :  { %3009 = vmatpush3.bf16.msra.mxu1 %v3649_v33  ;;  %3081 = vmatpush3.bf16.msra.mxu0 %v3649_v33  ;;  %4559 = vst [vmem:[#allocation12_spill] sm:$0xff] %v3801_v50  ;;  %v3825_v34 = vsub.f32 %v3768_v57, %v4531_v58  ;;  %v3023_v30 = vpack.c.bf16 %v175_v21, %v168_v14  ;;  %v215_v52 = vand.u32 4294901760, %v3728_v6  ;;  %v4563_v22 = vand.u32 4294901760, %v3659_v38 }
  0x3d   :  { %3010 = vmatprep.subr.bf16.mxu1 %v4533_v0  ;;  %3082 = vmatprep.subr.bf16.mxu0 %v4533_v0  ;;  %4560 = vst [vmem:[#allocation13_spill] sm:$0xff] %v3819_v54  ;;  %v195_v35 = vsub.f32 %v3717_v2, %v194_v39  ;;  %v202_v48 = vsub.f32 %v3722_v3, %v201_v16  ;;  %v4564_v14 = vmov 0.0   ;;  %v4565_v21 = vand.u32 4294901760, %v3663_v41 }
  0x3e   :  { %4561 = vst [vmem:[#allocation14_spill] sm:$0xff] %v3825_v34  ;;  %v216_v24 = vsub.f32 %v3728_v6, %v215_v52  ;;  %v4567_v26 = vmov 0.0|0.0  }
  0x40   :  { %3012 = vmatpush3.bf16.msra.mxu1 %v3675_v43  ;;  %3084 = vmatpush3.bf16.msra.mxu0 %v3675_v43  ;;  %v217_v54 = vand.u32 4294901760, %v216_v24 }
  0x41   :  { %3013 = vmatprep.subr.bf16.mxu1 %v4533_v0  ;;  %3085 = vmatprep.subr.bf16.mxu0 %v4533_v0 }
  0x44   :  { %3015 = vmatpush3.bf16.msra.mxu1 %v3700_v56  ;;  %3087 = vmatpush3.bf16.msra.mxu0 %v3700_v56 }
  0x45   :  { %3016 = vmatprep.subr.bf16.mxu1 %v4533_v0  ;;  %3088 = vmatprep.subr.bf16.mxu0 %v4533_v0 }
  0x48   :  { %3018 = vmatpush3.bf16.msra.mxu1 %v3734_v7  ;;  %3090 = vmatpush3.bf16.msra.mxu0 %v3734_v7 }
  0x49   :  { %3019 = vmatprep.subr.bf16.mxu1 %v4533_v0  ;;  %3091 = vmatprep.subr.bf16.mxu0 %v4533_v0 }
  0x4b   :  { %2398 = vmatmul.mubr.f32.vlgmr.msra.gmra.mrb[0].mxu1 %v143_v59  ;;  %2503 = vmatmul.mubr.f32.vlgmr.msra.gmra.mrb[0].mxu0 %v141_v55  ;;  %v4562_v55 = vand.u32 4294901760, %v3657_v37  ;;  %v4566_v59 = vand.u32 4294901760, %v3684_v49 }
  0x4c   :  { %3021 = vmatpush3.bf16.msra.mxu1 %v3020_v20  ;;  %3093 = vmatpush3.bf16.msra.mxu0 %v3092_v11  ;;  %v3840_v11 = vsub.f32 %v3659_v38, %v4563_v22  ;;  %v3026_v20 = vpack.c.bf16 %v189_v44, %v182_v45  ;;  %v196_v38 = vand.u32 4294901760, %v195_v35  ;;  %v203_v22 = vand.u32 4294901760, %v202_v48 }
  0x4d   :  { %3022 = vmatprep.subr.bf16.mxu1 %v4533_v0  ;;  %3094 = vmatprep.subr.bf16.mxu0 %v4533_v0  ;;  %v3835_v15 = vsub.f32 %v3657_v37, %v4562_v55  ;;  %v3098_v58 = vpack.c.bf16 %v4566_v59, %v4565_v21  ;;  %v209_v37 = vsub.f32 %v3726_v5, %v208_v29  ;;  %v222_v55 = vand.u32 4294901760, %v3807_v51 }
  0x4e   :  { %2432 = vmatprep.mubr.msk.f32.mxu1 %vm3542_vm0, %v4564_v14  ;;  %2537 = vmatprep.mubr.msk.f32.mxu0 %vm3542_vm0, %v4564_v14  ;;  %v229_v0 = vand.u32 4294901760, %v3812_v1  ;;  %v4568_v44 = vand.u32 4294901760, %v3679_v46  ;;  %v4569_v21 = vand.u32 4294901760, %v3681_v47  ;;  %v3029_v34 = vpack.c.bf16 %v203_v22, %v196_v38 }
  0x4f   :  { %v210_v35 = vand.u32 4294901760, %v209_v37  ;;  %v223_v48 = vsub.f32 %v3807_v51, %v222_v55  ;;  %v236_v59 = vand.u32 4294901760, %v3835_v15 }
  0x50   :  { %3024 = vmatpush3.bf16.msra.mxu1 %v3023_v30  ;;  %3096 = vmatpush3.bf16.msra.mxu0 %v3095_v61  ;;  %v3859_v45 = vsub.f32 %v3679_v46, %v4568_v44  ;;  %v3864_v30 = vsub.f32 %v3681_v47, %v4569_v21  ;;  %v3101_v61 = vpack.c.bf16 %v201_v16, %v194_v39  ;;  %v243_v46 = vand.u32 4294901760, %v3840_v11 }
  0x51   :  { %3025 = vmatprep.subr.bf16.mxu1 %v4567_v26  ;;  %3097 = vmatprep.subr.bf16.mxu0 %v4567_v26  ;;  %v230_v50 = vsub.f32 %v3812_v1, %v229_v0  ;;  %v3104_v47 = vpack.c.bf16 %v215_v52, %v208_v29  ;;  %v224_v44 = vand.u32 4294901760, %v223_v48  ;;  %v237_v16 = vsub.f32 %v3835_v15, %v236_v59 }
  0x52   :  { %v250_v39 = vand.u32 4294901760, %v3859_v45  ;;  %v244_v24 = vsub.f32 %v3840_v11, %v243_v46  ;;  %v257_v37 = vand.u32 4294901760, %v3864_v30  ;;  %v3107_v38 = vpack.c.bf16 %v229_v0, %v222_v55 }
  0x53   :  { %v238_v22 = vand.u32 4294901760, %v237_v16  ;;  %v3044_v48 = vpack.c.bf16 %v3634_v28, %v3632_v27  ;;  %v3050_v27 = vpack.c.bf16 %v3684_v49, %v3663_v41  ;;  %v4570_v28 = vand.u32 4294901760, %v3712_v63 }
  0x54   :  { %3027 = vmatpush3.bf16.msra.mxu1 %v3026_v20  ;;  %3099 = vmatpush3.bf16.msra.mxu0 %v3098_v58  ;;  %v3032_v20 = vpack.c.bf16 %v217_v54, %v210_v35  ;;  %v231_v58 = vand.u32 4294901760, %v230_v50  ;;  %v245_v52 = vand.u32 4294901760, %v244_v24  ;;  %v251_v21 = vsub.f32 %v3859_v45, %v250_v39 }
  0x55   :  { %3028 = vmatprep.subr.bf16.mxu1 %v4567_v26  ;;  %3100 = vmatprep.subr.bf16.mxu0 %v4567_v26  ;;  %v3110_v50 = vpack.c.bf16 %v243_v46, %v236_v59  ;;  %v3113_v55 = vpack.c.bf16 %v257_v37, %v250_v39  ;;  %v3047_v59 = vpack.c.bf16 %v3653_v36, %v3645_v32  ;;  %v4571_v32 = vand.u32 4294901760, %v3724_v4  ;;  %v717_v4 = vld [vmem:[#allocation5 + $0xc8] sm:$0xff]  ;;  %v723_v46 = vld [vmem:[#allocation5 + $0xf8] sm:$0xff] }
  0x56   :  { %v3035_v29 = vpack.c.bf16 %v231_v58, %v224_v44  ;;  %v3038_v54 = vpack.c.bf16 %v245_v52, %v238_v22  ;;  %v4572_v36 = vand.u32 4294901760, %v3737_v9  ;;  %v4573_v41 = vand.u32 4294901760, %v3739_v10  ;;  %v718_v9 = vld [vmem:[#allocation5 + $0xd0] sm:$0xff]  ;;  %v719_v10 = vld [vmem:[#allocation5 + $0xd8] sm:$0xff] }
  0x57   :  { %v4577_v63 = vand.u32 4294901760, %v3768_v57  ;;  %v721_v57 = vld [vmem:[#allocation5 + $0xe8] sm:$0xff]  ;;  %v825_v22 = vand.u32 4294901760, %v3773_v60 }
  0x58   :  { %3030 = vmatpush3.bf16.msra.mxu1 %v3029_v34  ;;  %3102 = vmatpush3.bf16.msra.mxu0 %v3101_v61  ;;  %v258_v34 = vsub.f32 %v3864_v30, %v257_v37  ;;  %v252_v61 = vand.u32 4294901760, %v251_v21  ;;  %v770_v37 = vand.u32 4294901760, %v723_v46 }
  0x59   :  { %3031 = vmatprep.subr.bf16.mxu1 %v4567_v26  ;;  %3103 = vmatprep.subr.bf16.mxu0 %v4567_v26 }
  0x5a   :  { %v259_v35 = vand.u32 4294901760, %v258_v34  ;;  %v4002_v21 = vsub.f32 %v723_v46, %v770_v37 }
  0x5c   :  { %3033 = vmatpush3.bf16.msra.mxu1 %v3032_v20  ;;  %3105 = vmatpush3.bf16.msra.mxu0 %v3104_v47  ;;  %v3041_v0 = vpack.c.bf16 %v259_v35, %v252_v61  ;;  %v839_v61 = vand.u32 4294901760, %v3788_v8 }
  0x5d   :  { %3034 = vmatprep.subr.bf16.mxu1 %v4567_v26  ;;  %3106 = vmatprep.subr.bf16.mxu0 %v4567_v26 }
  0x60   :  { %3036 = vmatpush3.bf16.msra.mxu1 %v3035_v29  ;;  %3108 = vmatpush3.bf16.msra.mxu0 %v3107_v38  ;;  %v818_v38 = vand.u32 4294901760, %v3764_v40 }
  0x61   :  { %3037 = vmatprep.subr.bf16.mxu1 %v4567_v26  ;;  %3109 = vmatprep.subr.bf16.mxu0 %v4567_v26 }
  0x62   :  { %v819_v34 = vsub.f32 %v3764_v40, %v818_v38 }
  0x64   :  { %3039 = vmatpush3.bf16.msra.mxu1 %v3038_v54  ;;  %3111 = vmatpush3.bf16.msra.mxu0 %v3110_v50  ;;  %v826_v54 = vsub.f32 %v3773_v60, %v825_v22  ;;  %v832_v50 = vand.u32 4294901760, %v3783_v53  ;;  %v820_v35 = vand.u32 4294901760, %v819_v34 }
  0x65   :  { %3040 = vmatprep.subr.bf16.mxu1 %v4567_v26  ;;  %3112 = vmatprep.subr.bf16.mxu0 %v4567_v26 }
  0x68   :  { %3042 = vmatpush3.bf16.msra.mxu1 %v3041_v0  ;;  %3114 = vmatpush3.bf16.msra.mxu0 %v3113_v55  ;;  %v827_v0 = vand.u32 4294901760, %v826_v54  ;;  %v833_v55 = vsub.f32 %v3783_v53, %v832_v50 }
  0x69   :  { %3043 = vmatprep.subr.bf16.mxu1 %v4567_v26  ;;  %3115 = vmatprep.subr.bf16.mxu0 %v4567_v26 }
  0x6b   :  { %2433 = vmatmul.mubr.f32.vlgmr.msra.gmra.mrb[0].mxu1 %v3643_v31  ;;  %2538 = vmatmul.mubr.f32.vlgmr.msra.gmra.mrb[0].mxu0 %v3643_v31 }
  0x6c   :  { %3045 = vmatpush3.bf16.msra.mxu1 %v3044_v48  ;;  %3117 = vmatpush3.bf16.msra.mxu0 %v3602_v12  ;;  %v3053_v12 = vpack.c.bf16 %v3722_v3, %v3717_v2  ;;  %v716_v3 = vld [vmem:[#allocation5 + $0xc0] sm:$0xff]  ;;  %v840_v48 = vsub.f32 %v3788_v8, %v839_v61 }
  0x6d   :  { %3046 = vmatprep.subr.bf16.mxu1 %v4567_v26  ;;  %3118 = vmatprep.subr.bf16.mxu0 %v4567_v26 }
  0x6e   :  { %2467 = vmatprep.mubr.msk.f32.mxu1 %vm3542_vm0, %v4564_v14  ;;  %2572 = vmatprep.mubr.msk.f32.mxu0 %vm3542_vm0, %v4564_v14 }
  0x70   :  { %3048 = vmatpush3.bf16.msra.mxu1 %v3047_v59  ;;  %3120 = vmatpush3.bf16.msra.mxu0 %v3606_v13  ;;  %v3056_v13 = vpack.c.bf16 %v3728_v6, %v3726_v5  ;;  %v749_v5 = vand.u32 4294901760, %v716_v3  ;;  %v752_v6 = vand.u32 4294901760, %v717_v4  ;;  %v4020_v59 = vpack.c.bf16 %v827_v0, %v820_v35 }
  0x71   :  { %3049 = vmatprep.subr.bf16.mxu1 %v4567_v26  ;;  %3121 = vmatprep.subr.bf16.mxu0 %v4567_v26 }
  0x72   :  { %v3982_v47 = vsub.f32 %v716_v3, %v749_v5  ;;  %v3984_v44 = vsub.f32 %v717_v4, %v752_v6 }
  0x74   :  { %3051 = vmatpush3.bf16.msra.mxu1 %v3050_v27  ;;  %3123 = vmatpush3.bf16.msra.mxu0 %v3616_v18  ;;  %v3059_v18 = vpack.c.bf16 %v3812_v1, %v3807_v51  ;;  %v3065_v1 = vpack.c.bf16 %v3864_v30, %v3859_v45  ;;  %v720_v51 = vld [vmem:[#allocation5 + $0xe0] sm:$0xff]  ;;  %v722_v30 = vld [vmem:[#allocation5 + $0xf0] sm:$0xff]  ;;  %v834_v27 = vand.u32 4294901760, %v833_v55 }
  0x75   :  { %3052 = vmatprep.subr.bf16.mxu1 %v4567_v26  ;;  %3124 = vmatprep.subr.bf16.mxu0 %v4567_v26  ;;  %v767_v24 = vand.u32 4294901760, %v722_v30 }
  0x77   :  { %v3998_v29 = vpack.c.bf16 %v770_v37, %v767_v24  ;;  %v4000_v52 = vsub.f32 %v722_v30, %v767_v24 }
  0x78   :  { %3054 = vmatpush3.bf16.msra.mxu1 %v3053_v12  ;;  %3126 = vmatpush3.bf16.msra.mxu0 %v3628_v23  ;;  %v3062_v23 = vpack.c.bf16 %v3840_v11, %v3835_v15  ;;  %v761_v15 = vand.u32 4294901760, %v720_v51  ;;  %v764_v11 = vand.u32 4294901760, %v721_v57  ;;  %v841_v12 = vand.u32 4294901760, %v840_v48 }
  0x79   :  { %3055 = vmatprep.subr.bf16.mxu1 %v4567_v26  ;;  %3127 = vmatprep.subr.bf16.mxu0 %v4567_v26 }
  0x7a   :  { %v3980_v45 = vpack.c.bf16 %v764_v11, %v761_v15  ;;  %v3991_v20 = vsub.f32 %v720_v51, %v761_v15  ;;  %v3993_v58 = vsub.f32 %v721_v57, %v764_v11 }
  0x7c   :  { %3057 = vmatpush3.bf16.msra.mxu1 %v3056_v13  ;;  %3129 = vmatpush3.bf16.msra.mxu0 %v3649_v33  ;;  %v3936_v33 = vpack.c.bf16 %v4571_v32, %v4570_v28  ;;  %v846_v13 = vand.u32 4294901760, %v3796_v62  ;;  %v4543_v0 = vand.u32 4294901760, %v3991_v20  ;;  %v4542_v55 = vand.u32 4294901760, %v3993_v58 }
  0x7d   :  { %3058 = vmatprep.subr.bf16.mxu1 %v4567_v26  ;;  %3130 = vmatprep.subr.bf16.mxu0 %v4567_v26 }
  0x7e   :  { %v847_v28 = vsub.f32 %v3796_v62, %v846_v13 }
  0x80   :  { %3060 = vmatpush3.bf16.msra.mxu1 %v3059_v18  ;;  %3132 = vmatpush3.bf16.msra.mxu0 %v3675_v43  ;;  %v3947_v43 = vpack.c.bf16 %v4573_v41, %v4572_v36  ;;  %v4578_v18 = vld [vmem:[#allocation12_spill] sm:$0xff]  ;;  %v848_v36 = vand.u32 4294901760, %v847_v28 }
  0x81   :  { %3061 = vmatprep.subr.bf16.mxu1 %v4567_v26  ;;  %3133 = vmatprep.subr.bf16.mxu0 %v4567_v26 }
  0x84   :  { %3063 = vmatpush3.bf16.msra.mxu1 %v3062_v23  ;;  %3135 = vmatpush3.bf16.msra.mxu0 %v3700_v56  ;;  %v4576_v56 = vand.u32 4294901760, %v3758_v25  ;;  %v4550_v23 = vand.u32 4294901760, %v4578_v18 }
  0x85   :  { %3064 = vmatprep.subr.bf16.mxu1 %v4567_v26  ;;  %3136 = vmatprep.subr.bf16.mxu0 %v4567_v26 }
  0x86   :  { %v3967_v2 = vpack.c.bf16 %v4577_v63, %v4576_v56  ;;  %v854_v32 = vsub.f32 %v4578_v18, %v4550_v23  ;;  %v4580_v56 = vld [vmem:[#allocation14_spill] sm:$0xff] }
  0x87   :  { %v4548_v63 = vand.u32 4294901760, %v4580_v56 }
  0x88   :  { %3066 = vmatpush3.bf16.msra.mxu1 %v3065_v1  ;;  %3138 = vmatpush3.bf16.msra.mxu0 %v3734_v7  ;;  %v3972_v7 = vpack.c.bf16 %v752_v6, %v749_v5  ;;  %v4024_v1 = vpack.c.bf16 %v841_v12, %v834_v27  ;;  %v855_v41 = vand.u32 4294901760, %v854_v32  ;;  %v903_v27 = vsub.f32 %v3991_v20, %v4543_v0 }
  0x89   :  { %3139 = vmatprep.subr.bf16.mxu1 %v4567_v26  ;;  %3283 = vmatprep.subr.bf16.mxu0 %v4567_v26  ;;  %v868_v5 = vsub.f32 %v4580_v56, %v4548_v63  ;;  %v910_v12 = vsub.f32 %v3993_v58, %v4542_v55 }
  0x8a   :  { %v3170_v3 = vpack.c.bf16 %v855_v41, %v848_v36  ;;  %v904_v28 = vand.u32 4294901760, %v903_v27  ;;  %v4541_v36 = vand.u32 4294901760, %v4000_v52  ;;  %v4540_v41 = vand.u32 4294901760, %v4002_v21 }
  0x8b   :  { %2468 = vmatmul.mubr.f32.vlgmr.msra.gmra.mrb[0].mxu1 %v3667_v42  ;;  %2573 = vmatmul.mubr.f32.vlgmr.msra.gmra.mrb[0].mxu0 %v3643_v31  ;;  %v4574_v31 = vand.u32 4294901760, %v3748_v17  ;;  %v4575_v42 = vand.u32 4294901760, %v3750_v19  ;;  %v755_v17 = vand.u32 4294901760, %v718_v9  ;;  %v758_v19 = vand.u32 4294901760, %v719_v10 }
  0x8c   :  { %3141 = vmatpush3.bf16.msra.mxu1 %v3936_v33  ;;  %2607 = vmatprep.mubr.msk.f32.mxu1 %vm3542_vm0, %v4564_v14  ;;  %v911_v32 = vand.u32 4294901760, %v910_v12  ;;  %v3206_v27 = vpack.c.bf16 %v3993_v58, %v3991_v20  ;;  %v3209_v12 = vpack.c.bf16 %v4002_v21, %v4000_v52 }
  0x8d   :  { %3142 = vmatprep.subr.bf16.mxu1 %v4567_v26  ;;  %2817 = vmatprep.mubr.msk.f32.mxu0 %vm3542_vm0, %v4564_v14  ;;  %v3959_v49 = vpack.c.bf16 %v4575_v42, %v4574_v31  ;;  %v3976_v25 = vpack.c.bf16 %v758_v19, %v755_v17  ;;  %v3986_v16 = vsub.f32 %v718_v9, %v755_v17  ;;  %v4579_v31 = vld [vmem:[#allocation13_spill] sm:$0xff]  ;;  %v869_v9 = vand.u32 4294901760, %v868_v5 }
  0x8e   :  { %v3988_v39 = vsub.f32 %v719_v10, %v758_v19  ;;  %v4549_v42 = vand.u32 4294901760, %v4579_v31  ;;  %v4547_v10 = vand.u32 4294901760, %v3982_v47  ;;  %v4546_v17 = vand.u32 4294901760, %v3984_v44 }
  0x8f   :  { %v4545_v30 = vand.u32 4294901760, %v3986_v16  ;;  %v917_v5 = vsub.f32 %v4000_v52, %v4541_v36 }
  0x90   :  { %3144 = vmatpush3.bf16.msra.mxu1 %v3947_v43  ;;  %v861_v4 = vsub.f32 %v4579_v31, %v4549_v42  ;;  %v875_v51 = vsub.f32 %v3982_v47, %v4547_v10  ;;  %v882_v57 = vsub.f32 %v3984_v44, %v4546_v17  ;;  %v4544_v46 = vand.u32 4294901760, %v3988_v39 }
  0x91   :  { %3145 = vmatprep.subr.bf16.mxu1 %v4567_v26  ;;  %v889_v37 = vsub.f32 %v3986_v16, %v4545_v30 }
  0x92   :  { %v862_v6 = vand.u32 4294901760, %v861_v4  ;;  %v876_v15 = vand.u32 4294901760, %v875_v51  ;;  %v883_v11 = vand.u32 4294901760, %v882_v57  ;;  %v896_v34 = vsub.f32 %v3988_v39, %v4544_v46 }
  0x93   :  { %v890_v54 = vand.u32 4294901760, %v889_v37  ;;  %v3182_v4 = vpack.c.bf16 %v911_v32, %v904_v28  ;;  %v3194_v37 = vpack.c.bf16 %v4578_v18, %v3796_v62  ;;  %v4587_v62 = vand.u32 4294901760, %v3986_v16 }
  0x94   :  { %3147 = vmatpush3.bf16.msra.mxu1 %v3959_v49  ;;  %v3173_v19 = vpack.c.bf16 %v869_v9, %v862_v6  ;;  %v3176_v24 = vpack.c.bf16 %v883_v11, %v876_v15  ;;  %v897_v35 = vand.u32 4294901760, %v896_v34  ;;  %v924_v6 = vsub.f32 %v4002_v21, %v4540_v41  ;;  %v4581_v41 = vld [vmem:[#allocation11_spill] sm:$0xff] }
  0x95   :  { %3148 = vmatprep.subr.bf16.mxu1 %v4567_v26  ;;  %v918_v9 = vand.u32 4294901760, %v917_v5  ;;  %v3188_v15 = vpack.c.bf16 %v3773_v60, %v3764_v40  ;;  %v3191_v11 = vpack.c.bf16 %v3788_v8, %v3783_v53  ;;  %v3197_v34 = vpack.c.bf16 %v4580_v56, %v4579_v31 }
  0x96   :  { %v3179_v48 = vpack.c.bf16 %v897_v35, %v890_v54  ;;  %v925_v51 = vand.u32 4294901760, %v924_v6  ;;  %v3200_v54 = vpack.c.bf16 %v3984_v44, %v3982_v47  ;;  %v3203_v35 = vpack.c.bf16 %v3988_v39, %v3986_v16 }
  0x97   :  { %v4582_v40 = vand.u32 4294901760, %v4578_v18  ;;  %v4584_v53 = vand.u32 4294901760, %v4580_v56  ;;  %v4590_v56 = vand.u32 4294901760, %v3993_v58  ;;  %v1386_v58 = vld [vmem:[#allocation5 + $0x160] sm:$0xff] }
  0x98   :  { %3150 = vmatpush3.bf16.msra.mxu1 %v3967_v2  ;;  %v3185_v57 = vpack.c.bf16 %v925_v51, %v918_v9  ;;  %v2056_v51 = vld [vmem:[%s4515_s2] ss:$0 sm:$0xff] }
  0x99   :  { %3151 = vmatprep.subr.bf16.mxu1 %v4567_v26  ;;  %v3242_v60 = vpack.c.bf16 %v4582_v40, %v846_v13  ;;  %v4588_v13 = vand.u32 4294901760, %v3988_v39  ;;  %v1385_v39 = vld [vmem:[#allocation5 + $0x158] sm:$0xff] }
  0x9b   :  { %v3251_v18 = vpack.c.bf16 %v4588_v13, %v4587_v62 }
  0x9c   :  { %3153 = vmatpush3.bf16.msra.mxu1 %v3972_v7 }
  0x9d   :  { %3154 = vmatprep.subr.bf16.mxu1 %v4567_v26 }
  0xa0   :  { %3156 = vmatpush3.bf16.msra.mxu1 %v3976_v25 }
  0xa1   :  { %3157 = vmatprep.subr.bf16.mxu1 %v4567_v26 }
  0xa4   :  { %3159 = vmatpush3.bf16.msra.mxu1 %v3980_v45 }
  0xa5   :  { %3160 = vmatprep.subr.bf16.mxu1 %v4567_v26 }
  0xa8   :  { %3162 = vmatpush3.bf16.msra.mxu1 %v3998_v29 }
  0xa9   :  { %3163 = vmatprep.subr.bf16.mxu1 %v4567_v26 }
 0x15e   :  { %v400_v28 = vpop.f32.mrb[0].mxu1  ;;  %v695_v32 = vpop.f32.mrb[0].mxu0 }
 0x15f   :  { %v3427_v5 = vadd.f32 %v695_v32, %v400_v28  ;;  %v2469_v6 = vpop.f32.mrb[1].mxu1  ;;  %v2574_v9 = vpop.f32.mrb[1].mxu0 }
 0x160   :  { %v1380_v9 = vld [vmem:[#allocation5 + $0x130] sm:$0xff] }
 0x161   :  { %v699_v36 = vmul.f32 %v3427_v5, %v4581_v41 }
 0x163   :  { %v705_v55 = vadd.f32 %v2056_v51, %v699_v36  ;;  %v1378_v36 = vld [vmem:[#allocation5 + $0x120] sm:$0xff]  ;;  %v1381_v51 = vld [vmem:[#allocation5 + $0x138] sm:$0xff] }
 0x165   :  { %v4093_v0 = vadd.f32 %v705_v55, %v4581_v41  ;;  %v1377_v55 = vld [vmem:[#allocation5 + $0x118] sm:$0xff]  ;;  %v1379_v41 = vld [vmem:[#allocation5 + $0x128] sm:$0xff] }
 0x166   :  { %v1406_v5 = vand.u32 4294901760, %v1379_v41 }
 0x167   :  { %v4096_v46 = vand.u32 4294901760, %v4093_v0 }
 0x168   :  { %v4140_v23 = vsub.f32 %v1379_v41, %v1406_v5 }
 0x169   :  { %v4100_v30 = vsub.f32 %v4093_v0, %v4096_v46 }
 0x16b   :  { %v807_v28 = vand.u32 4294901760, %v4100_v30 }
 0x16d   :  { %v808_v32 = vsub.f32 %v4100_v30, %v807_v28 }
 0x16f   :  { %v809_v6 = vand.u32 4294901760, %v808_v32 }
 0x171   :  { %2608 = vmatmul.mubr.f32.vlgmr.msra.gmra.mrb[2].mxu1 %v809_v6 }
 0x172   :  { %3165 = vmatpush3.bf16.msra.mxu1 %v4020_v59  ;;  %2642 = vmatprep.mubr.msk.f32.mxu1 %vm3542_vm0, %v4564_v14  ;;  %v1374_v59 = vld [vmem:[#allocation5 + $0x100] sm:$0xff] }
 0x173   :  { %3166 = vmatprep.subr.bf16.mxu1 %v4567_v26 }
 0x176   :  { %3168 = vmatpush3.bf16.msra.mxu1 %v4024_v1  ;;  %v1375_v1 = vld [vmem:[#allocation5 + $0x108] sm:$0xff] }
 0x177   :  { %3169 = vmatprep.subr.bf16.mxu1 %v4567_v26 }
 0x17a   :  { %3171 = vmatpush3.bf16.msra.mxu1 %v3170_v3  ;;  %v1376_v3 = vld [vmem:[#allocation5 + $0x110] sm:$0xff] }
 0x17b   :  { %3172 = vmatprep.subr.bf16.mxu1 %v4567_v26 }
 0x17e   :  { %3174 = vmatpush3.bf16.msra.mxu1 %v3173_v19  ;;  %v1391_v19 = vand.u32 4294901760, %v1374_v59 }
 0x17f   :  { %3175 = vmatprep.subr.bf16.mxu1 %v4567_v26 }
 0x180   :  { %v4124_v6 = vsub.f32 %v1374_v59, %v1391_v19  ;;  %v1409_v59 = vand.u32 4294901760, %v1380_v9 }
 0x182   :  { %3177 = vmatpush3.bf16.msra.mxu1 %v3176_v24  ;;  %v1394_v24 = vand.u32 4294901760, %v1375_v1 }
 0x183   :  { %3178 = vmatprep.subr.bf16.mxu1 %v4567_v26 }
 0x184   :  { %v4122_v32 = vpack.c.bf16 %v1394_v24, %v1391_v19  ;;  %v1412_v19 = vand.u32 4294901760, %v1381_v51 }
 0x186   :  { %3180 = vmatpush3.bf16.msra.mxu1 %v3179_v48  ;;  %v1397_v48 = vand.u32 4294901760, %v1376_v3  ;;  %3285 = vmatpush3.bf16.msra.mxu0 %v4122_v32 }
 0x187   :  { %3181 = vmatprep.subr.bf16.mxu1 %v4567_v26  ;;  %3286 = vmatprep.subr.bf16.mxu0 %v4567_v26 }
 0x188   :  { %v4128_v17 = vsub.f32 %v1376_v3, %v1397_v48  ;;  %v4146_v3 = vsub.f32 %v1381_v51, %v1412_v19 }
 0x18a   :  { %3183 = vmatpush3.bf16.msra.mxu1 %v3182_v4  ;;  %v1400_v4 = vand.u32 4294901760, %v1377_v55  ;;  %v1498_v40 = vand.u32 4294901760, %v4128_v17 }
 0x18b   :  { %3184 = vmatprep.subr.bf16.mxu1 %v4567_v26 }
 0x18c   :  { %v4130_v10 = vsub.f32 %v1377_v55, %v1400_v4  ;;  %v4138_v42 = vpack.c.bf16 %v1400_v4, %v1397_v48 }
 0x18e   :  { %3186 = vmatpush3.bf16.msra.mxu1 %v3185_v57  ;;  %v1403_v57 = vand.u32 4294901760, %v1378_v36  ;;  %3288 = vmatpush3.bf16.msra.mxu0 %v4138_v42 }
 0x18f   :  { %3187 = vmatprep.subr.bf16.mxu1 %v4567_v26  ;;  %3289 = vmatprep.subr.bf16.mxu0 %v4567_v26 }
 0x190   :  { %v4132_v63 = vsub.f32 %v1378_v36, %v1403_v57 }
 0x191   :  { %2643 = vmatmul.mubr.f32.vlgmr.msra.gmra.mrb[2].mxu1 %v4096_v46 }
 0x192   :  { %3189 = vmatpush3.bf16.msra.mxu1 %v3188_v15  ;;  %2677 = vmatprep.mubr.msk.f32.mxu1 %vm3542_vm0, %v4564_v14  ;;  %v4126_v15 = vsub.f32 %v1375_v1, %v1394_v24  ;;  %v4144_v1 = vsub.f32 %v1380_v9, %v1409_v59  ;;  %v4160_v24 = vpack.c.bf16 %v1412_v19, %v1409_v59  ;;  %v1512_v13 = vand.u32 4294901760, %v4132_v63 }
 0x193   :  { %3190 = vmatprep.subr.bf16.mxu1 %v4567_v26 }
 0x194   :  { %v1491_v9 = vand.u32 4294901760, %v4126_v15 }
 0x196   :  { %3192 = vmatpush3.bf16.msra.mxu1 %v3191_v11  ;;  %v4152_v11 = vpack.c.bf16 %v1406_v5, %v1403_v57  ;;  %v1484_v5 = vand.u32 4294901760, %v4124_v6 }
 0x197   :  { %3193 = vmatprep.subr.bf16.mxu1 %v4567_v26 }
 0x198   :  { %3291 = vmatpush3.bf16.msra.mxu0 %v4152_v11 }
 0x199   :  { %3292 = vmatprep.subr.bf16.mxu0 %v4567_v26 }
 0x19a   :  { %3195 = vmatpush3.bf16.msra.mxu1 %v3194_v37  ;;  %v3236_v37 = vpack.c.bf16 %v825_v22, %v818_v38  ;;  %v4583_v38 = vand.u32 4294901760, %v4579_v31  ;;  %v4585_v22 = vand.u32 4294901760, %v3982_v47  ;;  %v4589_v31 = vand.u32 4294901760, %v3991_v20 }
 0x19b   :  { %3196 = vmatprep.subr.bf16.mxu1 %v4567_v26  ;;  %v4591_v47 = vand.u32 4294901760, %v4000_v52  ;;  %v1424_v20 = vand.u32 4294901760, %v1385_v39  ;;  %v1427_v52 = vand.u32 4294901760, %v1386_v58 }
 0x19c   :  { %3294 = vmatpush3.bf16.msra.mxu0 %v4160_v24  ;;  %v3245_v8 = vpack.c.bf16 %v4584_v53, %v4583_v38 }
 0x19d   :  { %3295 = vmatprep.subr.bf16.mxu0 %v4567_v26  ;;  %v4280_v48 = vsub.f32 %v1385_v39, %v1424_v20  ;;  %v4283_v36 = vsub.f32 %v1386_v58, %v1427_v52 }
 0x19e   :  { %3198 = vmatpush3.bf16.msra.mxu1 %v3197_v34  ;;  %v3239_v34 = vpack.c.bf16 %v839_v61, %v832_v50  ;;  %v4586_v50 = vand.u32 4294901760, %v3984_v44  ;;  %v4592_v44 = vand.u32 4294901760, %v4002_v21 }
 0x19f   :  { %3199 = vmatprep.subr.bf16.mxu1 %v4567_v26 }
 0x1a0   :  { %v3248_v61 = vpack.c.bf16 %v4586_v50, %v4585_v22 }
 0x1a2   :  { %3201 = vmatpush3.bf16.msra.mxu1 %v3200_v54  ;;  %v3257_v54 = vpack.c.bf16 %v4592_v44, %v4591_v47 }
 0x1a3   :  { %3202 = vmatprep.subr.bf16.mxu1 %v4567_v26 }
 0x1a6   :  { %3204 = vmatpush3.bf16.msra.mxu1 %v3203_v35  ;;  %v1388_v35 = vld [vmem:[#allocation5 + $0x170] sm:$0xff] }
 0x1a7   :  { %3205 = vmatprep.subr.bf16.mxu1 %v4567_v26  ;;  %v1433_v4 = vand.u32 4294901760, %v1388_v35 }
 0x1a9   :  { %v4292_v59 = vsub.f32 %v1388_v35, %v1433_v4 }
 0x1aa   :  { %3207 = vmatpush3.bf16.msra.mxu1 %v3206_v27  ;;  %v1389_v27 = vld [vmem:[#allocation5 + $0x178] sm:$0xff] }
 0x1ab   :  { %3208 = vmatprep.subr.bf16.mxu1 %v4567_v26  ;;  %v1436_v57 = vand.u32 4294901760, %v1389_v27 }
 0x1ad   :  { %v4290_v51 = vpack.c.bf16 %v1436_v57, %v1433_v4  ;;  %v4294_v19 = vsub.f32 %v1389_v27, %v1436_v57  ;;  %v4555_v4 = vand.u32 4294901760, %v4280_v48 }
 0x1ae   :  { %3210 = vmatpush3.bf16.msra.mxu1 %v3209_v12 }
 0x1af   :  { %3211 = vmatprep.subr.bf16.mxu1 %v4567_v26 }
 0x1b1   :  { %2678 = vmatmul.mubr.f32.vlgmr.msra.gmra.mrb[2].mxu1 %v4100_v30  ;;  %v3254_v30 = vpack.c.bf16 %v4590_v56, %v4589_v31  ;;  %v1513_v56 = vsub.f32 %v4132_v63, %v1512_v13 }
 0x1b2   :  { %3213 = vmatpush3.bf16.msra.mxu1 %v3936_v33  ;;  %2712 = vmatprep.mubr.msk.f32.mxu1 %vm3542_vm0, %v4564_v14 }
 0x1b3   :  { %3214 = vmatprep.subr.bf16.mxu1 %v4567_v26  ;;  %v1514_v47 = vand.u32 4294901760, %v1513_v56 }
 0x1b6   :  { %3216 = vmatpush3.bf16.msra.mxu1 %v3947_v43 }
 0x1b7   :  { %3217 = vmatprep.subr.bf16.mxu1 %v4567_v26 }
 0x1ba   :  { %3219 = vmatpush3.bf16.msra.mxu1 %v3959_v49 }
 0x1bb   :  { %3220 = vmatprep.subr.bf16.mxu1 %v4567_v26 }
 0x1be   :  { %3222 = vmatpush3.bf16.msra.mxu1 %v3967_v2 }
 0x1bf   :  { %3223 = vmatprep.subr.bf16.mxu1 %v4567_v26 }
 0x1c2   :  { %3225 = vmatpush3.bf16.msra.mxu1 %v3972_v7 }
 0x1c3   :  { %3226 = vmatprep.subr.bf16.mxu1 %v4567_v26 }
 0x1c6   :  { %3228 = vmatpush3.bf16.msra.mxu1 %v3976_v25 }
 0x1c7   :  { %3229 = vmatprep.subr.bf16.mxu1 %v4567_v26 }
 0x1ca   :  { %3231 = vmatpush3.bf16.msra.mxu1 %v3980_v45 }
 0x1cb   :  { %3232 = vmatprep.subr.bf16.mxu1 %v4567_v26 }
 0x1ce   :  { %3234 = vmatpush3.bf16.msra.mxu1 %v3998_v29 }
 0x1cf   :  { %3235 = vmatprep.subr.bf16.mxu1 %v4567_v26 }
 0x1d1   :  { %2713 = vmatmul.mubr.f32.vlgmr.msra.gmra.mrb[2].mxu1 %v807_v28 }
 0x1d2   :  { %3237 = vmatpush3.bf16.msra.mxu1 %v3236_v37  ;;  %2747 = vmatprep.mubr.msk.f32.mxu1 %vm3542_vm0, %v4564_v14  ;;  %v1485_v37 = vsub.f32 %v4124_v6, %v1484_v5 }
 0x1d3   :  { %3238 = vmatprep.subr.bf16.mxu1 %v4567_v26 }
 0x1d4   :  { %v1486_v38 = vand.u32 4294901760, %v1485_v37 }
 0x1d6   :  { %3240 = vmatpush3.bf16.msra.mxu1 %v3239_v34  ;;  %v1492_v34 = vsub.f32 %v4126_v15, %v1491_v9 }
 0x1d7   :  { %3241 = vmatprep.subr.bf16.mxu1 %v4567_v26 }
 0x1d8   :  { %v1493_v53 = vand.u32 4294901760, %v1492_v34  ;;  %v1562_v34 = vsub.f32 %v4280_v48, %v4555_v4 }
 0x1da   :  { %3243 = vmatpush3.bf16.msra.mxu1 %v3242_v60  ;;  %v1505_v60 = vand.u32 4294901760, %v4130_v10  ;;  %v4312_v50 = vpack.c.bf16 %v1493_v53, %v1486_v38  ;;  %v1563_v53 = vand.u32 4294901760, %v1562_v34  ;;  %v3338_v34 = vpack.c.bf16 %v4140_v23, %v4132_v63 }
 0x1db   :  { %3244 = vmatprep.subr.bf16.mxu1 %v4567_v26  ;;  %v4595_v63 = vand.u32 4294901760, %v4280_v48 }
 0x1dc   :  { %v1506_v22 = vsub.f32 %v4130_v10, %v1505_v60 }
 0x1de   :  { %3246 = vmatpush3.bf16.msra.mxu1 %v3245_v8  ;;  %v1499_v8 = vsub.f32 %v4128_v17, %v1498_v40  ;;  %v1507_v62 = vand.u32 4294901760, %v1506_v22 }
 0x1df   :  { %3247 = vmatprep.subr.bf16.mxu1 %v4567_v26 }
 0x1e2   :  { %3249 = vmatpush3.bf16.msra.mxu1 %v3248_v61  ;;  %v1500_v61 = vand.u32 4294901760, %v1499_v8  ;;  %v4554_v8 = vand.u32 4294901760, %v4283_v36 }
 0x1e3   :  { %3250 = vmatprep.subr.bf16.mxu1 %v4567_v26 }
 0x1e4   :  { %v4316_v31 = vpack.c.bf16 %v1507_v62, %v1500_v61  ;;  %v1569_v62 = vsub.f32 %v4283_v36, %v4554_v8 }
 0x1e6   :  { %3252 = vmatpush3.bf16.msra.mxu1 %v3251_v18  ;;  %v1519_v18 = vand.u32 4294901760, %v4140_v23 }
 0x1e7   :  { %3253 = vmatprep.subr.bf16.mxu1 %v4567_v26 }
 0x1ea   :  { %3255 = vmatpush3.bf16.msra.mxu1 %v3254_v30  ;;  %v1520_v30 = vsub.f32 %v4140_v23, %v1519_v18 }
 0x1eb   :  { %3256 = vmatprep.subr.bf16.mxu1 %v4567_v26 }
 0x1ec   :  { %v1521_v44 = vand.u32 4294901760, %v1520_v30  ;;  %v1570_v30 = vand.u32 4294901760, %v1569_v62 }
 0x1ee   :  { %3258 = vmatpush3.bf16.msra.mxu1 %v3257_v54  ;;  %v1526_v54 = vand.u32 4294901760, %v4144_v1 }
 0x1ef   :  { %3259 = vmatprep.subr.bf16.mxu1 %v4567_v26 }
 0x1f1   :  { %2748 = vmatmul.mubr.f32.vlgmr.msra.gmra.mrb[2].mxu1 %v4096_v46 }
 0x1f2   :  { %3261 = vmatpush3.bf16.msra.mxu1 %v3936_v33  ;;  %2782 = vmatprep.mubr.msk.f32.mxu1 %vm3542_vm0, %v4564_v14  ;;  %v1382_v33 = vld [vmem:[#allocation5 + $0x140] sm:$0xff] }
 0x1f3   :  { %3262 = vmatprep.subr.bf16.mxu1 %v4567_v26 }
 0x1f6   :  { %3264 = vmatpush3.bf16.msra.mxu1 %v3947_v43  ;;  %v1383_v43 = vld [vmem:[#allocation5 + $0x148] sm:$0xff] }
 0x1f7   :  { %3265 = vmatprep.subr.bf16.mxu1 %v4567_v26 }
 0x1fa   :  { %3267 = vmatpush3.bf16.msra.mxu1 %v3959_v49  ;;  %v1415_v49 = vand.u32 4294901760, %v1382_v33 }
 0x1fb   :  { %3268 = vmatprep.subr.bf16.mxu1 %v4567_v26 }
 0x1fc   :  { %v4274_v12 = vsub.f32 %v1382_v33, %v1415_v49  ;;  %v1533_v33 = vand.u32 4294901760, %v4146_v3 }
 0x1fe   :  { %3270 = vmatpush3.bf16.msra.mxu1 %v3967_v2  ;;  %v1418_v2 = vand.u32 4294901760, %v1383_v43 }
 0x1ff   :  { %3271 = vmatprep.subr.bf16.mxu1 %v4567_v26 }
 0x200   :  { %v4264_v16 = vpack.c.bf16 %v1418_v2, %v1415_v49  ;;  %v4276_v28 = vsub.f32 %v1383_v43, %v1418_v2  ;;  %v3314_v43 = vpack.c.bf16 %v1521_v44, %v1514_v47  ;;  %v1527_v49 = vsub.f32 %v4144_v1, %v1526_v54 }
 0x201   :  { %v1534_v2 = vsub.f32 %v4146_v3, %v1533_v33  ;;  %v4552_v44 = vand.u32 4294901760, %v4292_v59 }
 0x202   :  { %3273 = vmatpush3.bf16.msra.mxu1 %v3972_v7  ;;  %v1384_v7 = vld [vmem:[#allocation5 + $0x150] sm:$0xff]  ;;  %3297 = vmatpush3.bf16.msra.mxu0 %v4264_v16 }
 0x203   :  { %3274 = vmatprep.subr.bf16.mxu1 %v4567_v26  ;;  %3298 = vmatprep.subr.bf16.mxu0 %v4567_v26  ;;  %v1535_v39 = vand.u32 4294901760, %v1534_v2 }
 0x206   :  { %3276 = vmatpush3.bf16.msra.mxu1 %v3976_v25  ;;  %v1421_v25 = vand.u32 4294901760, %v1384_v7 }
 0x207   :  { %3277 = vmatprep.subr.bf16.mxu1 %v4567_v26 }
 0x208   :  { %v4278_v55 = vsub.f32 %v1384_v7, %v1421_v25  ;;  %v1528_v7 = vand.u32 4294901760, %v1527_v49  ;;  %v4551_v49 = vand.u32 4294901760, %v4294_v19 }
 0x20a   :  { %3279 = vmatpush3.bf16.msra.mxu1 %v3980_v45  ;;  %v4268_v45 = vpack.c.bf16 %v1424_v20, %v1421_v25  ;;  %v1540_v25 = vand.u32 4294901760, %v4274_v12  ;;  %v4557_v20 = vand.u32 4294901760, %v4276_v28  ;;  %v3317_v58 = vpack.c.bf16 %v1535_v39, %v1528_v7 }
 0x20b   :  { %3280 = vmatprep.subr.bf16.mxu1 %v4567_v26  ;;  %v4556_v27 = vand.u32 4294901760, %v4278_v55  ;;  %v1583_v7 = vsub.f32 %v4292_v59, %v4552_v44  ;;  %v1590_v39 = vsub.f32 %v4294_v19, %v4551_v49  ;;  %v3347_v62 = vpack.c.bf16 %v4280_v48, %v4278_v55 }
 0x20c   :  { %3300 = vmatpush3.bf16.msra.mxu0 %v4268_v45  ;;  %v4594_v23 = vand.u32 4294901760, %v4278_v55 }
 0x20d   :  { %3301 = vmatprep.subr.bf16.mxu0 %v4567_v26  ;;  %v1555_v37 = vsub.f32 %v4278_v55, %v4556_v27 }
 0x20e   :  { %3282 = vmatpush3.bf16.msra.mxu1 %v3998_v29  ;;  %v1387_v29 = vld [vmem:[#allocation5 + $0x168] sm:$0xff] }
 0x20f   :  { %v1430_v21 = vand.u32 4294901760, %v1387_v29  ;;  %v1556_v38 = vand.u32 4294901760, %v1555_v37  ;;  %v3335_v37 = vpack.c.bf16 %v4130_v10, %v4128_v17  ;;  %v3389_v10 = vpack.c.bf16 %v1533_v33, %v1526_v54 }
 0x210   :  { %v4593_v17 = vand.u32 4294901760, %v4276_v28 }
 0x211   :  { %2783 = vmatmul.mubr.f32.vlgmr.msra.gmra.mrb[2].mxu1 %v4096_v46  ;;  %v4272_v46 = vpack.c.bf16 %v1430_v21, %v1427_v52  ;;  %v4285_v41 = vsub.f32 %v1387_v29, %v1430_v21  ;;  %v1541_v29 = vsub.f32 %v4274_v12, %v1540_v25  ;;  %v1548_v52 = vsub.f32 %v4276_v28, %v4557_v20 }
 0x212   :  { %v3323_v61 = vpack.c.bf16 %v1563_v53, %v1556_v38  ;;  %v3341_v38 = vpack.c.bf16 %v4146_v3, %v4144_v1  ;;  %v3344_v53 = vpack.c.bf16 %v4276_v28, %v4274_v12  ;;  %v4596_v1 = vand.u32 4294901760, %v4283_v36 }
 0x213   :  { %3303 = vmatpush3.bf16.msra.mxu0 %v4272_v46  ;;  %v1542_v21 = vand.u32 4294901760, %v1541_v29  ;;  %v1549_v35 = vand.u32 4294901760, %v1548_v52  ;;  %v4553_v22 = vand.u32 4294901760, %v4285_v41  ;;  %v1584_v29 = vand.u32 4294901760, %v1583_v7  ;;  %v2057_v7 = vld [vmem:[%s4515_s2 + $0x1] ss:$0 sm:$0xff] }
 0x214   :  { %3304 = vmatprep.subr.bf16.mxu0 %v4567_v26  ;;  %v1591_v52 = vand.u32 4294901760, %v1590_v39  ;;  %v4383_v39 = vld [vmem:[#allocation2] sm:$0x3]  ;;  %v4597_v3 = vand.u32 4294901760, %v4285_v41  ;;  %v4598_v12 = vand.u32 4294901760, %v4292_v59  ;;  %v4599_v28 = vand.u32 4294901760, %v4294_v19 }
 0x215   :  { %v3320_v57 = vpack.c.bf16 %v1549_v35, %v1542_v21  ;;  %v1576_v56 = vsub.f32 %v4285_v41, %v4553_v22  ;;  %v3332_v35 = vpack.c.bf16 %v4126_v15, %v4124_v6  ;;  %v3386_v6 = vpack.c.bf16 %v1519_v18, %v1512_v13 }
 0x216   :  { %v3329_v21 = vpack.c.bf16 %v1591_v52, %v1584_v29  ;;  %v3392_v15 = vpack.c.bf16 %v4593_v17, %v1540_v25 }
 0x217   :  { %3306 = vmatpush3.bf16.msra.mxu0 %v4290_v51  ;;  %v1577_v47 = vand.u32 4294901760, %v1576_v56  ;;  %v3350_v56 = vpack.c.bf16 %v4285_v41, %v4283_v36 }
 0x218   :  { %3307 = vmatprep.subr.bf16.mxu0 %v4567_v26 }
 0x219   :  { %v3326_v2 = vpack.c.bf16 %v1577_v47, %v1570_v30  ;;  %v3353_v30 = vpack.c.bf16 %v4294_v19, %v4292_v59 }
 0x2e4   :  { %v1361_v47 = vpop.f32.mrb[2].mxu1 }
 0x2e5   :  { %v1365_v29 = vmul.f32 %v4383_v39, %v1361_v47  ;;  %v2784_v52 = vpop.f32.mrb[3].mxu1 }
 0x2e7   :  { %v1371_v49 = vadd.f32 %v2057_v7, %v1365_v29 }
 0x2e9   :  { %v4387_v44 = vadd.f32 %v1371_v49, %v4093_v0  ;;  %v3380_v0 = vpack.c.bf16 %v1491_v9, %v1484_v5  ;;  %v3395_v5 = vpack.c.bf16 %v4595_v63, %v4594_v23  ;;  %v3398_v9 = vpack.c.bf16 %v4597_v3, %v4596_v1 }
 0x2eb   :  { %v4390_v22 = vand.u32 4294901760, %v4387_v44 }
 0x2ed   :  { %v1472_v8 = vsub.f32 %v4387_v44, %v4390_v22 }
 0x2ef   :  { %v1473_v4 = vand.u32 4294901760, %v1472_v8 }
 0x2f1   :  { %v1474_v27 = vsub.f32 %v1472_v8, %v1473_v4 }
 0x2f3   :  { %v1475_v20 = vand.u32 4294901760, %v1474_v27 }
 0x2f5   :  { %2818 = vmatmul.mubr.f32.vlgmr.msra.gmra.mrb[2].mxu0 %v1475_v20 }
 0x2f6   :  { %3309 = vmatpush3.bf16.msra.mxu0 %v4312_v50  ;;  %2852 = vmatprep.mubr.msk.f32.mxu0 %vm3542_vm0, %v4564_v14  ;;  %v3383_v50 = vpack.c.bf16 %v1505_v60, %v1498_v40  ;;  %v3401_v40 = vpack.c.bf16 %v4599_v28, %v4598_v12 }
 0x2f7   :  { %3310 = vmatprep.subr.bf16.mxu0 %v4567_v26 }
 0x2fa   :  { %3312 = vmatpush3.bf16.msra.mxu0 %v4316_v31 }
 0x2fb   :  { %3313 = vmatprep.subr.bf16.mxu0 %v4567_v26 }
 0x2fe   :  { %3315 = vmatpush3.bf16.msra.mxu0 %v3314_v43 }
 0x2ff   :  { %3316 = vmatprep.subr.bf16.mxu0 %v4567_v26 }
 0x302   :  { %3318 = vmatpush3.bf16.msra.mxu0 %v3317_v58 }
 0x303   :  { %3319 = vmatprep.subr.bf16.mxu0 %v4567_v26 }
 0x306   :  { %3321 = vmatpush3.bf16.msra.mxu0 %v3320_v57 }
 0x307   :  { %3322 = vmatprep.subr.bf16.mxu0 %v4567_v26 }
 0x30a   :  { %3324 = vmatpush3.bf16.msra.mxu0 %v3323_v61 }
 0x30b   :  { %3325 = vmatprep.subr.bf16.mxu0 %v4567_v26 }
 0x30e   :  { %3327 = vmatpush3.bf16.msra.mxu0 %v3326_v2 }
 0x30f   :  { %3328 = vmatprep.subr.bf16.mxu0 %v4567_v26 }
 0x312   :  { %3330 = vmatpush3.bf16.msra.mxu0 %v3329_v21 }
 0x313   :  { %3331 = vmatprep.subr.bf16.mxu0 %v4567_v26 }
 0x315   :  { %2853 = vmatmul.mubr.f32.vlgmr.msra.gmra.mrb[2].mxu0 %v4390_v22 }
 0x316   :  { %3333 = vmatpush3.bf16.msra.mxu0 %v3332_v35  ;;  %2887 = vmatprep.mubr.msk.f32.mxu0 %vm3542_vm0, %v4564_v14 }
 0x317   :  { %3334 = vmatprep.subr.bf16.mxu0 %v4567_v26 }
 0x31a   :  { %3336 = vmatpush3.bf16.msra.mxu0 %v3335_v37 }
 0x31b   :  { %3337 = vmatprep.subr.bf16.mxu0 %v4567_v26 }
 0x31e   :  { %3339 = vmatpush3.bf16.msra.mxu0 %v3338_v34 }
 0x31f   :  { %3340 = vmatprep.subr.bf16.mxu0 %v4567_v26 }
 0x322   :  { %3342 = vmatpush3.bf16.msra.mxu0 %v3341_v38 }
 0x323   :  { %3343 = vmatprep.subr.bf16.mxu0 %v4567_v26 }
 0x326   :  { %3345 = vmatpush3.bf16.msra.mxu0 %v3344_v53 }
 0x327   :  { %3346 = vmatprep.subr.bf16.mxu0 %v4567_v26 }
 0x32a   :  { %3348 = vmatpush3.bf16.msra.mxu0 %v3347_v62 }
 0x32b   :  { %3349 = vmatprep.subr.bf16.mxu0 %v4567_v26 }
 0x32e   :  { %3351 = vmatpush3.bf16.msra.mxu0 %v3350_v56 }
 0x32f   :  { %3352 = vmatprep.subr.bf16.mxu0 %v4567_v26 }
 0x332   :  { %3354 = vmatpush3.bf16.msra.mxu0 %v3353_v30 }
 0x333   :  { %3355 = vmatprep.subr.bf16.mxu0 %v4567_v26 }
 0x335   :  { %2888 = vmatmul.mubr.f32.vlgmr.msra.gmra.mrb[2].mxu0 %v1472_v8 }
 0x336   :  { %3357 = vmatpush3.bf16.msra.mxu0 %v4122_v32  ;;  %2922 = vmatprep.mubr.msk.f32.mxu0 %vm3542_vm0, %v4564_v14 }
 0x337   :  { %3358 = vmatprep.subr.bf16.mxu0 %v4567_v26 }
 0x33a   :  { %3360 = vmatpush3.bf16.msra.mxu0 %v4138_v42 }
 0x33b   :  { %3361 = vmatprep.subr.bf16.mxu0 %v4567_v26 }
 0x33e   :  { %3363 = vmatpush3.bf16.msra.mxu0 %v4152_v11 }
 0x33f   :  { %3364 = vmatprep.subr.bf16.mxu0 %v4567_v26 }
 0x342   :  { %3366 = vmatpush3.bf16.msra.mxu0 %v4160_v24 }
 0x343   :  { %3367 = vmatprep.subr.bf16.mxu0 %v4567_v26 }
 0x346   :  { %3369 = vmatpush3.bf16.msra.mxu0 %v4264_v16 }
 0x347   :  { %3370 = vmatprep.subr.bf16.mxu0 %v4567_v26 }
 0x34a   :  { %3372 = vmatpush3.bf16.msra.mxu0 %v4268_v45 }
 0x34b   :  { %3373 = vmatprep.subr.bf16.mxu0 %v4567_v26 }
 0x34e   :  { %3375 = vmatpush3.bf16.msra.mxu0 %v4272_v46 }
 0x34f   :  { %3376 = vmatprep.subr.bf16.mxu0 %v4567_v26 }
 0x352   :  { %3378 = vmatpush3.bf16.msra.mxu0 %v4290_v51 }
 0x353   :  { %3379 = vmatprep.subr.bf16.mxu0 %v4567_v26 }
 0x355   :  { %2923 = vmatmul.mubr.f32.vlgmr.msra.gmra.mrb[2].mxu0 %v1473_v4 }
 0x356   :  { %3381 = vmatpush3.bf16.msra.mxu0 %v3380_v0  ;;  %2957 = vmatprep.mubr.msk.f32.mxu0 %vm3542_vm0, %v4564_v14 }
 0x357   :  { %3382 = vmatprep.subr.bf16.mxu0 %v4567_v26 }
 0x35a   :  { %3384 = vmatpush3.bf16.msra.mxu0 %v3383_v50 }
 0x35b   :  { %3385 = vmatprep.subr.bf16.mxu0 %v4567_v26 }
 0x35e   :  { %3387 = vmatpush3.bf16.msra.mxu0 %v3386_v6 }
 0x35f   :  { %3388 = vmatprep.subr.bf16.mxu0 %v4567_v26 }
 0x362   :  { %3390 = vmatpush3.bf16.msra.mxu0 %v3389_v10 }
 0x363   :  { %3391 = vmatprep.subr.bf16.mxu0 %v4567_v26 }
 0x366   :  { %3393 = vmatpush3.bf16.msra.mxu0 %v3392_v15 }
 0x367   :  { %3394 = vmatprep.subr.bf16.mxu0 %v4567_v26 }
 0x36a   :  { %3396 = vmatpush3.bf16.msra.mxu0 %v3395_v5 }
 0x36b   :  { %3397 = vmatprep.subr.bf16.mxu0 %v4567_v26 }
 0x36e   :  { %3399 = vmatpush3.bf16.msra.mxu0 %v3398_v9 }
 0x36f   :  { %3400 = vmatprep.subr.bf16.mxu0 %v4567_v26 }
 0x372   :  { %3402 = vmatpush3.bf16.msra.mxu0 %v3401_v40 }
 0x373   :  { %3403 = vmatprep.subr.bf16.mxu0 %v4567_v26 }
 0x375   :  { %2958 = vmatmul.mubr.f32.vlgmr.msra.gmra.mrb[2].mxu0 %v4390_v22 }
 0x376   :  { %3405 = vmatpush3.bf16.msra.mxu0 %v4122_v32  ;;  %2992 = vmatprep.mubr.msk.f32.mxu0 %vm3542_vm0, %v4564_v14 }
 0x377   :  { %3406 = vmatprep.subr.bf16.mxu0 %v4567_v26 }
 0x37a   :  { %3408 = vmatpush3.bf16.msra.mxu0 %v4138_v42  ;;  %v2058_v42 = vld [vmem:[%s4515_s2 + $0x2] ss:$0 sm:$0xff] }
 0x37b   :  { %3409 = vmatprep.subr.bf16.mxu0 %v4567_v26 }
 0x37e   :  { %3411 = vmatpush3.bf16.msra.mxu0 %v4152_v11 }
 0x37f   :  { %3412 = vmatprep.subr.bf16.mxu0 %v4567_v26 }
 0x382   :  { %3414 = vmatpush3.bf16.msra.mxu0 %v4160_v24 }
 0x383   :  { %3415 = vmatprep.subr.bf16.mxu0 %v4567_v26 }
 0x386   :  { %3417 = vmatpush3.bf16.msra.mxu0 %v4264_v16 }
 0x387   :  { %3418 = vmatprep.subr.bf16.mxu0 %v4567_v26 }
 0x38a   :  { %3420 = vmatpush3.bf16.msra.mxu0 %v4268_v45 }
 0x38b   :  { %3421 = vmatprep.subr.bf16.mxu0 %v4567_v26 }
 0x38e   :  { %3423 = vmatpush3.bf16.msra.mxu0 %v4272_v46 }
 0x38f   :  { %3424 = vmatprep.subr.bf16.mxu0 %v4567_v26 }
 0x392   :  { %3426 = vmatpush3.bf16.msra.mxu0 %v4290_v51 }
 0x395   :  { %2993 = vmatmul.mubr.f32.vlgmr.msra.gmra.mrb[2].mxu0 %v4390_v22 }
 0x468   :  { %v2027_v14 = vpop.f32.mrb[2].mxu0 }
 0x469   :  { %v2031_v32 = vmul.f32 %v4383_v39, %v2027_v14  ;;  %v2994_v11 = vpop.f32.mrb[3].mxu0 }
 0x46b   :  { %v2037_v24 = vadd.f32 %v2058_v42, %v2031_v32 }
 0x46d   :  { %v2038_v16 = vadd.f32 %v2037_v24, %v4387_v44 }
 0x46f   :  { %2039 = vst [vmem:[#allocation7] sm:$0x3] %v2038_v16 }
 0x470   :  { %3520 = shalt.err (!%p3517_p6)
}
 0x471   :  { %s3521_s2 = scalar_lea.hbm %s4516_s3, 32 }
 0x472   :  { %p3522_p7 = scmp.ne.s32.totalorder %s4516_s3, %s3521_s2  ;;  %p3525_p8 = scmp.lt.u32.totalorder %s3521_s2, %s4516_s3 }
 0x474   :  { %p3527_p9 = pnand %p3525_p8, %p3522_p7 }
 0x476   :  { %3530 = shalt.err (!%p3527_p9)
}
 0x477   :  { %2049 = dma.vmem_to_hbm [thread:$0]  %s2047_s16, 32, %s4516_s3, [#allocation4]  }
 0x478   :  { %3535 = dma.done.wait [#allocation4], 32  }
 0x479   :  { %3536 = vsyncadd [#allocation4], 4294967264 }
 0x47a   :  { %2053 = vsyncpa [#allocation3], 1 }
 0x47b   :  { %2054 = vsyncpa [#allocation6], 1 }
 0x47c   :  { %2055 = vsyncpa [#allocation4], 1 }

</bundles_post_ra>
